<compile_context>
chip_gen: v6e
topology: v6e:2x2x1
jax: 0.10.0
libtpu: 0.0.40
codegen_flags: <defaults>
</compile_context>

<pallas_src>
import functools
import math

import jax
import jax.numpy as jnp
from jax.experimental import pallas as pl
from jax.experimental.pallas import tpu as pltpu

_LANES = 128
_SUBLANES = 8


# ---------------------------------------------------------------------------
# Kernel: one grid step processes one (tr, 128) row tile for ALL margin pairs.
# ---------------------------------------------------------------------------
def _margin_loss_kernel(margins, inv_n, x1_ref, x2_ref, y_ref, mask_ref, o_ref):
    @pl.when(pl.program_id(0) == 0)
    def _init():
        o_ref[...] = jnp.zeros_like(o_ref)

    y = y_ref[...]            # (tr, 128) f32 labels (+1 / -1)
    mask = mask_ref[...]      # (tr, 128) f32, 1.0 = valid element, 0.0 = padding

    acc = jnp.zeros(y.shape, jnp.float32)
    for p, margin in enumerate(margins):          # static unroll, len(margins) <= 4
        diff = x1_ref[p] - x2_ref[p]              # (tr, 128)
        acc = acc + jnp.maximum(jnp.float32(margin) - y * diff, 0.0)
    acc = acc * mask

    # reduce lanes then sublanes -> (1, 1), accumulate into the resident output
    partial = jnp.sum(jnp.sum(acc, axis=1, keepdims=True), axis=0, keepdims=True)
    o_ref[...] += partial * jnp.float32(inv_n)


# ---------------------------------------------------------------------------
# Wrapper: build the static pair list from `num`, flatten/pad to lane-dense
# (rows, 128) tiles, run one fused pallas_call.
# ---------------------------------------------------------------------------
def _build_pairs(tensor0, tensor3, tensor_mid, num, dis1, dis2):
    if num == 2:
        return [(tensor0, tensor3, dis1)]
    if num == 3:
        mid1 = tensor_mid[0]
        return [(tensor0, tensor3, dis1),
                (tensor0, mid1, dis1),
                (mid1, tensor3, dis2)]
    if num == 4:
        mid1, mid2 = tensor_mid[0], tensor_mid[1]
        return [(tensor0, tensor3, dis1),
                (tensor0, mid1, dis1),
                (mid1, mid2, dis2),
                (mid2, tensor3, dis2)]
    raise ValueError(f"num must be 2, 3 or 4, got {num}")


def four_margin_loss(tensor0, tensor3, labels, num, *tensor_mid,
                     dis1=0.7, dis2=0.3, block_rows=512):
    pairs = _build_pairs(tensor0, tensor3, tensor_mid, num, dis1, dis2)
    margins = tuple(float(m) for _, _, m in pairs)
    n_pairs = len(pairs)

    # common broadcast shape of every loss term (all inputs normally identical)
    shape = jnp.broadcast_shapes(labels.shape,
                                 *[t.shape for pair in pairs for t in pair[:2]])
    n = max(1, math.prod(shape))

    cols = _LANES
    rows = pl.cdiv(n, cols)
    tr = min(block_rows, _SUBLANES * pl.cdiv(rows, _SUBLANES))   # multiple of 8
    rows_padded = tr * pl.cdiv(rows, tr)
    grid = rows_padded // tr
    pad_total = rows_padded * cols

    def tile(t):
        flat = jnp.broadcast_to(t, shape).reshape(-1).astype(jnp.float32)
        flat = jnp.pad(flat, (0, pad_total - n))
        return flat.reshape(rows_padded, cols)

    x1s = jnp.stack([tile(a) for a, _, _ in pairs])    # (P, rows_padded, 128)
    x2s = jnp.stack([tile(b) for _, b, _ in pairs])    # (P, rows_padded, 128)
    y = tile(labels)                                   # (rows_padded, 128)
    mask = jnp.pad(jnp.ones((n,), jnp.float32),
                   (0, pad_total - n)).reshape(rows_padded, cols)

    kernel = functools.partial(_margin_loss_kernel, margins, 1.0 / float(n))
    out = pl.pallas_call(
        kernel,
        out_shape=jax.ShapeDtypeStruct((1, 1), jnp.float32),
        grid=(grid,),
        in_specs=[
            pl.BlockSpec((n_pairs, tr, cols), lambda r: (0, r, 0)),
            pl.BlockSpec((n_pairs, tr, cols), lambda r: (0, r, 0)),
            pl.BlockSpec((tr, cols), lambda r: (r, 0)),
            pl.BlockSpec((tr, cols), lambda r: (r, 0)),
        ],
        out_specs=pl.BlockSpec((1, 1), lambda r: (0, 0)),
        compiler_params=pltpu.CompilerParams(
            # output block is resident / accumulated across the row-tile axis
            dimension_semantics=("arbitrary",),
        ),
    )(x1s, x2s, y, mask)
    return out[0, 0]


# ---------------------------------------------------------------------------
# Pure-JAX reference (matches torch.nn.MarginRankingLoss semantics).
# ---------------------------------------------------------------------------
def _margin_ranking_loss_ref(x1, x2, y, margin):
    return jnp.mean(jnp.maximum(-y * (x1 - x2) + margin, 0.0))


def _four_margin_loss_ref(tensor0, tensor3, labels, num, *tensor_mid,
                          dis1=0.7, dis2=0.3):
    pairs = _build_pairs(tensor0, tensor3, tensor_mid, num, dis1, dis2)
    total = jnp.float32(0.0)
    for a, b, m in pairs:
        total = total + _margin_ranking_loss_ref(a, b, labels, m)
    return total


if __name__ == "__main__":
    key = jax.random.PRNGKey(0)
    k0, k1, k2, k3, k4 = jax.random.split(key, 5)

    # small score-like tensors (e.g. per-sample CLIP scores)
    shape = (2, 100)
    tensor0 = jax.random.normal(k0, shape, jnp.float32)
    tensor_mid1 = jax.random.normal(k1, shape, jnp.float32)
    tensor_mid2 = jax.random.normal(k2, shape, jnp.float32)
    tensor3 = jax.random.normal(k3, shape, jnp.float32)
    labels = jnp.where(jax.random.bernoulli(k4, 0.5, shape), 1.0, -1.0).astype(jnp.float32)

    # num == 4 branch (all four margin terms)
    out4 = jax.block_until_ready(
        four_margin_loss(tensor0, tensor3, labels, 4, tensor_mid1, tensor_mid2))
    ref4 = _four_margin_loss_ref(tensor0, tensor3, labels, 4, tensor_mid1, tensor_mid2)
    assert out4.shape == () and out4.dtype == jnp.float32
    assert jnp.allclose(out4, ref4, rtol=2e-5, atol=1e-5), (out4, ref4)

    # num == 3 branch
    out3 = jax.block_until_ready(
        four_margin_loss(tensor0, tensor3, labels, 3, tensor_mid1))
    ref3 = _four_margin_loss_ref(tensor0, tensor3, labels, 3, tensor_mid1)
    assert jnp.allclose(out3, ref3, rtol=2e-5, atol=1e-5), (out3, ref3)

    # num == 2 branch
    out2 = jax.block_until_ready(four_margin_loss(tensor0, tensor3, labels, 2))
    ref2 = _four_margin_loss_ref(tensor0, tensor3, labels, 2)
    assert jnp.allclose(out2, ref2, rtol=2e-5, atol=1e-5), (out2, ref2)

    print("KERNEL_OK")
</pallas_src>

<mosaic_0001>
module attributes {stable_mosaic.version = 11 : i64} {
  func.func @_margin_loss_kernel(%arg0: i32, %arg1: memref<4x8x128xf32, #tpu.memory_space<vmem>>, %arg2: memref<4x8x128xf32, #tpu.memory_space<vmem>>, %arg3: memref<8x128xf32, #tpu.memory_space<vmem>>, %arg4: memref<8x128xf32, #tpu.memory_space<vmem>>, %arg5: memref<1x1xf32, #tpu.memory_space<vmem>>) attributes {dimension_semantics = [#tpu.dimension_semantics<arbitrary>], iteration_bounds = array<i64: 1>, scalar_prefetch = 0 : i64, scratch_operands = 0 : i64, tpu.core_type = #tpu.core_type<tc>, window_params = [{transform_indices = @transform_0, window_bounds = array<i64: 4, 8, 128>}, {transform_indices = @transform_1, window_bounds = array<i64: 4, 8, 128>}, {transform_indices = @transform_2, window_bounds = array<i64: 8, 128>}, {transform_indices = @transform_3, window_bounds = array<i64: 8, 128>}, {pipeline_mode = #tpu.pipeline_mode<synchronous>, transform_indices = @transform_4, window_bounds = array<i64: 1, 1>}]} {
    %c0_i32 = arith.constant 0 : i32
    %0 = arith.cmpi eq, %arg0, %c0_i32 : i32
    %1 = arith.extui %0 : i1 to i32
    %c0_i32_0 = arith.constant 0 : i32
    %2 = arith.cmpi ne, %1, %c0_i32_0 : i32
    scf.if %2 {
      %cst_40 = arith.constant 0.000000e+00 : f32
      %60 = vector.broadcast %cst_40 : f32 to vector<1x1xf32>
      %c0_41 = arith.constant 0 : index
      %c0_42 = arith.constant 0 : index
      %61 = vector.load %arg5[%c0_41, %c0_42] : memref<1x1xf32, #tpu.memory_space<vmem>>, vector<1x1xf32>
      tpu.vector_store %arg5[%c0_41, %c0_42], %60 {strides = array<i32>} : memref<1x1xf32, #tpu.memory_space<vmem>>, vector<1x1xf32>,
    } else {
    }
    %c0 = arith.constant 0 : index
    %c0_1 = arith.constant 0 : index
    %3 = vector.load %arg3[%c0, %c0_1] : memref<8x128xf32, #tpu.memory_space<vmem>>, vector<8x128xf32>
    %c0_2 = arith.constant 0 : index
    %c0_3 = arith.constant 0 : index
    %4 = vector.load %arg4[%c0_2, %c0_3] : memref<8x128xf32, #tpu.memory_space<vmem>>, vector<8x128xf32>
    %cst = arith.constant 0.000000e+00 : f32
    %5 = vector.broadcast %cst : f32 to vector<8x128xf32>
    %c0_4 = arith.constant 0 : index
    %c0_5 = arith.constant 0 : index
    %c0_6 = arith.constant 0 : index
    %6 = vector.load %arg1[%c0_4, %c0_5, %c0_6] : memref<4x8x128xf32, #tpu.memory_space<vmem>>, vector<1x8x128xf32>
    %7 = vector.shape_cast %6 : vector<1x8x128xf32> to vector<8x128xf32>
    %c0_7 = arith.constant 0 : index
    %c0_8 = arith.constant 0 : index
    %c0_9 = arith.constant 0 : index
    %8 = vector.load %arg2[%c0_7, %c0_8, %c0_9] : memref<4x8x128xf32, #tpu.memory_space<vmem>>, vector<1x8x128xf32>
    %9 = vector.shape_cast %8 : vector<1x8x128xf32> to vector<8x128xf32>
    %10 = arith.subf %7, %9 : vector<8x128xf32>
    %11 = arith.mulf %3, %10 : vector<8x128xf32>
    %cst_10 = arith.constant 0.699999988 : f32
    %12 = vector.broadcast %cst_10 : f32 to vector<8x128xf32>
    %13 = arith.subf %12, %11 : vector<8x128xf32>
    %cst_11 = arith.constant 0.000000e+00 : f32
    %14 = vector.broadcast %cst_11 : f32 to vector<8x128xf32>
    %15 = arith.maximumf %13, %14 : vector<8x128xf32>
    %16 = arith.addf %5, %15 : vector<8x128xf32>
    %c1 = arith.constant 1 : index
    %c0_12 = arith.constant 0 : index
    %c0_13 = arith.constant 0 : index
    %17 = vector.load %arg1[%c1, %c0_12, %c0_13] : memref<4x8x128xf32, #tpu.memory_space<vmem>>, vector<1x8x128xf32>
    %18 = vector.shape_cast %17 : vector<1x8x128xf32> to vector<8x128xf32>
    %c1_14 = arith.constant 1 : index
    %c0_15 = arith.constant 0 : index
    %c0_16 = arith.constant 0 : index
    %19 = vector.load %arg2[%c1_14, %c0_15, %c0_16] : memref<4x8x128xf32, #tpu.memory_space<vmem>>, vector<1x8x128xf32>
    %20 = vector.shape_cast %19 : vector<1x8x128xf32> to vector<8x128xf32>
    %21 = arith.subf %18, %20 : vector<8x128xf32>
    %22 = arith.mulf %3, %21 : vector<8x128xf32>
    %cst_17 = arith.constant 0.699999988 : f32
    %23 = vector.broadcast %cst_17 : f32 to vector<8x128xf32>
    %24 = arith.subf %23, %22 : vector<8x128xf32>
    %cst_18 = arith.constant 0.000000e+00 : f32
    %25 = vector.broadcast %cst_18 : f32 to vector<8x128xf32>
    %26 = arith.maximumf %24, %25 : vector<8x128xf32>
    %27 = arith.addf %16, %26 : vector<8x128xf32>
    %c2 = arith.constant 2 : index
    %c0_19 = arith.constant 0 : index
    %c0_20 = arith.constant 0 : index
    %28 = vector.load %arg1[%c2, %c0_19, %c0_20] : memref<4x8x128xf32, #tpu.memory_space<vmem>>, vector<1x8x128xf32>
    %29 = vector.shape_cast %28 : vector<1x8x128xf32> to vector<8x128xf32>
    %c2_21 = arith.constant 2 : index
    %c0_22 = arith.constant 0 : index
    %c0_23 = arith.constant 0 : index
    %30 = vector.load %arg2[%c2_21, %c0_22, %c0_23] : memref<4x8x128xf32, #tpu.memory_space<vmem>>, vector<1x8x128xf32>
    %31 = vector.shape_cast %30 : vector<1x8x128xf32> to vector<8x128xf32>
    %32 = arith.subf %29, %31 : vector<8x128xf32>
    %33 = arith.mulf %3, %32 : vector<8x128xf32>
    %cst_24 = arith.constant 3.000000e-01 : f32
    %34 = vector.broadcast %cst_24 : f32 to vector<8x128xf32>
    %35 = arith.subf %34, %33 : vector<8x128xf32>
    %cst_25 = arith.constant 0.000000e+00 : f32
    %36 = vector.broadcast %cst_25 : f32 to vector<8x128xf32>
    %37 = arith.maximumf %35, %36 : vector<8x128xf32>
    %38 = arith.addf %27, %37 : vector<8x128xf32>
    %c3 = arith.constant 3 : index
    %c0_26 = arith.constant 0 : index
    %c0_27 = arith.constant 0 : index
    %39 = vector.load %arg1[%c3, %c0_26, %c0_27] : memref<4x8x128xf32, #tpu.memory_space<vmem>>, vector<1x8x128xf32>
    %40 = vector.shape_cast %39 : vector<1x8x128xf32> to vector<8x128xf32>
    %c3_28 = arith.constant 3 : index
    %c0_29 = arith.constant 0 : index
    %c0_30 = arith.constant 0 : index
    %41 = vector.load %arg2[%c3_28, %c0_29, %c0_30] : memref<4x8x128xf32, #tpu.memory_space<vmem>>, vector<1x8x128xf32>
    %42 = vector.shape_cast %41 : vector<1x8x128xf32> to vector<8x128xf32>
    %43 = arith.subf %40, %42 : vector<8x128xf32>
    %44 = arith.mulf %3, %43 : vector<8x128xf32>
    %cst_31 = arith.constant 3.000000e-01 : f32
    %45 = vector.broadcast %cst_31 : f32 to vector<8x128xf32>
    %46 = arith.subf %45, %44 : vector<8x128xf32>
    %cst_32 = arith.constant 0.000000e+00 : f32
    %47 = vector.broadcast %cst_32 : f32 to vector<8x128xf32>
    %48 = arith.maximumf %46, %47 : vector<8x128xf32>
    %49 = arith.addf %38, %48 : vector<8x128xf32>
    %50 = arith.mulf %49, %4 : vector<8x128xf32>
    %cst_33 = arith.constant dense<0.000000e+00> : vector<8xf32>
    %51 = vector.multi_reduction <add>, %50, %cst_33 [1] : vector<8x128xf32> to vector<8xf32>
    %52 = vector.shape_cast %51 : vector<8xf32> to vector<8x1xf32>
    %cst_34 = arith.constant dense<0.000000e+00> : vector<1xf32>
    %53 = vector.multi_reduction <add>, %52, %cst_34 [0] : vector<8x1xf32> to vector<1xf32>
    %54 = vector.shape_cast %53 : vector<1xf32> to vector<1x1xf32>
    %c0_35 = arith.constant 0 : index
    %c0_36 = arith.constant 0 : index
    %55 = vector.load %arg5[%c0_35, %c0_36] : memref<1x1xf32, #tpu.memory_space<vmem>>, vector<1x1xf32>
    %cst_37 = arith.constant 5.000000e-03 : f32
    %56 = vector.broadcast %cst_37 : f32 to vector<1x1xf32>
    %57 = arith.mulf %54, %56 : vector<1x1xf32>
    %58 = arith.addf %55, %57 : vector<1x1xf32>
    %c0_38 = arith.constant 0 : index
    %c0_39 = arith.constant 0 : index
    %59 = vector.load %arg5[%c0_38, %c0_39] : memref<1x1xf32, #tpu.memory_space<vmem>>, vector<1x1xf32>
    tpu.vector_store %arg5[%c0_38, %c0_39], %58 {strides = array<i32>} : memref<1x1xf32, #tpu.memory_space<vmem>>, vector<1x1xf32>,
    return
  }
  func.func @transform_0(%arg0: i32) -> (i32, i32, i32) {
    %c0_i32 = arith.constant 0 : i32
    %c0_i32_0 = arith.constant 0 : i32
    %c0_i32_1 = arith.constant 0 : i32
    return %c0_i32, %arg0, %c0_i32_0 : i32, i32, i32
  }
  func.func @transform_1(%arg0: i32) -> (i32, i32, i32) {
    %c0_i32 = arith.constant 0 : i32
    %c0_i32_0 = arith.constant 0 : i32
    %c0_i32_1 = arith.constant 0 : i32
    return %c0_i32, %arg0, %c0_i32_0 : i32, i32, i32
  }
  func.func @transform_2(%arg0: i32) -> (i32, i32) {
    %c0_i32 = arith.constant 0 : i32
    %c0_i32_0 = arith.constant 0 : i32
    return %arg0, %c0_i32 : i32, i32
  }
  func.func @transform_3(%arg0: i32) -> (i32, i32) {
    %c0_i32 = arith.constant 0 : i32
    %c0_i32_0 = arith.constant 0 : i32
    return %arg0, %c0_i32 : i32, i32
  }
  func.func @transform_4(%arg0: i32) -> (i32, i32) {
    %c0_i32 = arith.constant 0 : i32
    %c0_i32_0 = arith.constant 0 : i32
    %c0_i32_1 = arith.constant 0 : i32
    return %c0_i32, %c0_i32_0 : i32, i32
  }
}

</mosaic_0001>

<bundles_post_ra>
// kernel: tpu_custom_call.1
= control target key start
LH: loop header
LB: loop body
LE: loop exit
PB: predicated region body
PF: predicated region fallthrough
CT: control target
= control target key end

     0   :  { %9 = vsyncpa [#allocation3], 0  ;;  %s308_s0 = inlined_call_operand.hbm [shape: f32[4,8,128], index: 0, kind: input, shape index: {}]   ;;  %s309_s1 = inlined_call_operand.hbm [shape: f32[4,8,128], index: 1, kind: input, shape index: {}]   ;;  %s310_s2 = inlined_call_operand.hbm [shape: f32[8,128], index: 2, kind: input, shape index: {}]   ;;  %s311_s3 = inlined_call_operand.hbm [shape: f32[8,128], index: 3, kind: input, shape index: {}]   ;;  %s312_s4 = inlined_call_operand.hbm [shape: f32[1,1], index: 4, kind: output, shape index: {}]  }
   0x1   :  { %10 = vsyncpa [#allocation6], 0 }
   0x2   :  { %11 = vsyncpa [#allocation9], 0 }
   0x3   :  { %12 = vsyncpa [#allocation4], 0  ;;  %s258_s15 = smov [#allocation5]   ;;  %s259_s17 = smov [#allocation2]  }
   0x4   :  { %s30_s16 = sshll.u32 %s258_s15, 4  ;;  %s18_s18 = sshll.u32 %s259_s17, 4  ;;  %s31_s16 = int_to_ptr.vmem [resolvable:$true] %s30_s16  ;;  %s19_s18 = int_to_ptr.vmem [resolvable:$true] %s18_s18 }
   0x5   :  { %s158_s19 = scalar_lea.vmem %s31_s16, 512  ;;  %p163_p1 = scmp.lt.s32.totalorder %s31_s16, %s31_s16 }
   0x6   :  { %p159_p0 = scmp.ne.s32.totalorder %s31_s16, %s158_s19  ;;  %p164_p2 = scmp.lt.s32.totalorder %s158_s19, %s158_s19 }
   0x8   :  { %p165_p3 = por %p164_p2, %p163_p1 }
   0xa   :  { %p166_p4 = pnand %p165_p3, %p159_p0 }
   0xc   :  { %169 = shalt.err (!%p166_p4)
}
   0xd   :  { %s260_s20 = smov 128   ;;  %s261_s21 = smov 8  }
   0xe   :  { %36 = dma.hbm_to_vmem [thread:$0]  %s309_s1, 512, %s31_s16, [#allocation6], %s260_s20, %s260_s20, %s261_s21  }
   0xf   :  { %s178_s24 = scalar_lea.vmem %s19_s18, 512  ;;  %p183_p6 = scmp.lt.s32.totalorder %s19_s18, %s19_s18 }
  0x10   :  { %p179_p5 = scmp.ne.s32.totalorder %s19_s18, %s178_s24  ;;  %p184_p7 = scmp.lt.s32.totalorder %s178_s24, %s178_s24 }
  0x12   :  { %p185_p8 = por %p184_p7, %p183_p6 }
  0x14   :  { %p186_p9 = pnand %p185_p8, %p179_p5 }
  0x16   :  { %189 = shalt.err (!%p186_p9)
}
  0x17   :  { %24 = dma.hbm_to_vmem [thread:$0]  %s308_s0, 512, %s19_s18, [#allocation3], %s260_s20, %s260_s20, %s261_s21  }
  0x18   :  { %s262_s27 = smov [#allocation7]   ;;  %s263_s29 = smov [#allocation8]  }
  0x19   :  { %s43_s28 = sshll.u32 %s262_s27, 4  ;;  %s53_s30 = sshll.u32 %s263_s29, 4  ;;  %s44_s28 = int_to_ptr.vmem [resolvable:$true] %s43_s28  ;;  %s54_s30 = int_to_ptr.vmem [resolvable:$true] %s53_s30 }
  0x1a   :  { %s198_s5 = scalar_lea.vmem %s44_s28, 128  ;;  %p203_p11 = scmp.lt.s32.totalorder %s44_s28, %s44_s28 }
  0x1b   :  { %p199_p10 = scmp.ne.s32.totalorder %s44_s28, %s198_s5  ;;  %p204_p12 = scmp.lt.s32.totalorder %s198_s5, %s198_s5 }
  0x1d   :  { %p205_p13 = por %p204_p12, %p203_p11 }
  0x1f   :  { %p206_p0 = pnand %p205_p13, %p199_p10 }
  0x21   :  { %209 = shalt.err (!%p206_p0)
}
  0x22   :  { %46 = dma.hbm_to_vmem [thread:$0]  %s310_s2, 128, %s44_s28, [#allocation6]  }
  0x23   :  { %s218_s7 = scalar_lea.vmem %s54_s30, 128  ;;  %p223_p2 = scmp.lt.s32.totalorder %s54_s30, %s54_s30 }
  0x24   :  { %p219_p1 = scmp.ne.s32.totalorder %s54_s30, %s218_s7  ;;  %p224_p3 = scmp.lt.s32.totalorder %s218_s7, %s218_s7 }
  0x26   :  { %p225_p4 = por %p224_p3, %p223_p2 }
  0x28   :  { %p226_p5 = pnand %p225_p4, %p219_p1 }
  0x2a   :  { %229 = shalt.err (!%p226_p5)
}
  0x2b   :  { %56 = dma.hbm_to_vmem [thread:$0]  %s311_s3, 128, %s54_s30, [#allocation9]  }
  0x2c   :  { %250 = dma.done.wait [#allocation3], 512  }
  0x2d   :  { %251 = vsyncadd [#allocation3], 4294966784 }
  0x2e   :  { %252 = dma.done.wait [#allocation6], 640  }
  0x2f   :  { %253 = vsyncadd [#allocation6], 4294966656 }
  0x30   :  { %254 = dma.done.wait [#allocation9], 128  }
  0x31   :  { %255 = vsyncadd [#allocation9], 4294967168  ;;  %vm73_vm0 = vcmask 0   ;;  %v264_v0 = vmov 0.0   ;;  %v75_v1 = vld [vmem:[#allocation7] sm:$0xff]  ;;  %v85_v4 = vld [vmem:[#allocation2 + $0x8] sm:$0xff] }
  0x32   :  { %74 = vst.msk [vmem:[#allocation10] sm:$0x1] %vm73_vm0, %v264_v0  ;;  %v77_v2 = vld [vmem:[#allocation2] sm:$0xff]  ;;  %v87_v5 = vld [vmem:[#allocation5 + $0x8] sm:$0xff]  ;;  %v94_v8 = vld [vmem:[#allocation2 + $0x10] sm:$0xff]  ;;  %s265_s2 = smov [#allocation10]  }
  0x33   :  { %v78_v3 = vld [vmem:[#allocation5] sm:$0xff]  ;;  %v88_v7 = vsub.f32 %v85_v4, %v87_v5  ;;  %v96_v9 = vld [vmem:[#allocation5 + $0x10] sm:$0xff]  ;;  %v103_v10 = vld [vmem:[#allocation2 + $0x18] sm:$0xff]  ;;  %s131_s3 = sshll.u32 %s265_s2, 4  ;;  %s132_s3 = int_to_ptr.vmem [resolvable:$true] %s131_s3 }
  0x34   :  { %v79_v6 = vsub.f32 %v77_v2, %v78_v3  ;;  %v97_v11 = vsub.f32 %v94_v8, %v96_v9  ;;  %v105_v12 = vld [vmem:[#allocation5 + $0x18] sm:$0xff]  ;;  %v76_v28 = vld [vmem:[#allocation8] sm:$0xff]  ;;  %s230_s9 = scalar_lea.vmem %s132_s3, 16  ;;  %s234_s10 = scalar_lea.vmem %s132_s3, 32 }
  0x35   :  { %v89_v14 = vmul.f32 %v88_v7, %v75_v1  ;;  %v106_v15 = vsub.f32 %v103_v10, %v105_v12  ;;  %p231_p6 = scmp.ne.s32.totalorder %s132_s3, %s230_s9  ;;  %p235_p7 = scmp.lt.s32.totalorder %s132_s3, %s132_s3 }
  0x36   :  { %v80_v13 = vmul.f32 %v79_v6, %v75_v1  ;;  %v98_v16 = vmul.f32 %v97_v11, %v75_v1  ;;  %p236_p8 = scmp.lt.s32.totalorder %s234_s10, %s230_s9 }
  0x37   :  { %v90_v18 = vsub.f32 0.7, %v89_v14  ;;  %v107_v19 = vmul.f32 %v106_v15, %v75_v1 }
  0x38   :  { %v81_v17 = vsub.f32 0.7, %v80_v13  ;;  %v99_v20 = vsub.f32 0.3, %v98_v16  ;;  %p237_p9 = por %p236_p8, %p235_p7 }
  0x39   :  { %v91_v22 = vmax.f32 %v90_v18, 0.0  ;;  %v108_v23 = vsub.f32 0.3, %v107_v19  ;;  %v120_v38 = vld [vmem:[#allocation10] sm:$0x1] }
  0x3a   :  { %v82_v21 = vmax.f32 %v81_v17, 0.0  ;;  %v100_v24 = vmax.f32 %v99_v20, 0.0  ;;  %p238_p10 = pnand %p237_p9, %p231_p6 }
  0x3b   :  { %v109_v26 = vmax.f32 %v108_v23, 0.0 }
  0x3c   :  { %v92_v25 = vadd.f32 %v91_v22, %v82_v21 }
  0x3e   :  { %v101_v27 = vadd.f32 %v100_v24, %v92_v25 }
  0x40   :  { %v110_v29 = vadd.f32 %v109_v26, %v101_v27 }
  0x42   :  { %v111_v30 = vmul.f32 %v110_v29, %v76_v28 }
  0x44   :  { %112 = vadd.xlane.f32.xlu0 %v111_v30 }
  0xcd   :  { %v113_v31 = vpop.xlane.xlu0 %112 }
  0xce   :  { %v114_v32 = vrot.slane %v113_v31, 4 }
  0xd0   :  { %v115_v33 = vadd.f32 %v114_v32, %v113_v31 }
  0xd2   :  { %v116_v34 = vrot.slane %v115_v33, 2 }
  0xd4   :  { %v117_v35 = vadd.f32 %v116_v34, %v115_v33 }
  0xd6   :  { %v118_v36 = vrot.slane %v117_v35, 1 }
  0xd8   :  { %v119_v37 = vadd.f32 %v118_v36, %v117_v35 }
  0xda   :  { %v121_v39 = vmul.f32 0.005, %v119_v37 }
  0xdc   :  { %v122_v40 = vadd.f32 %v121_v39, %v120_v38 }
  0xde   :  { %124 = vst.msk [vmem:[#allocation10] sm:$0x1] %vm73_vm0, %v122_v40 }
  0xdf   :  { %241 = shalt.err (!%p238_p10)
}
  0xe0   :  { %134 = dma.vmem_to_hbm [thread:$0]  %s132_s3, 16, %s312_s4, [#allocation4]  }
  0xe1   :  { %256 = dma.done.wait [#allocation4], 16  }
  0xe2   :  { %257 = vsyncadd [#allocation4], 4294967280 }
  0xe3   :  { %138 = vsyncpa [#allocation3], 1 }
  0xe4   :  { %139 = vsyncpa [#allocation6], 1 }
  0xe5   :  { %140 = vsyncpa [#allocation9], 1 }
  0xe6   :  { %141 = vsyncpa [#allocation4], 1 }

</bundles_post_ra>
